<compile_context>
chip_gen: v7x
topology: tpu7x:2x2x1
jax: 0.10.0
libtpu: 0.0.40
codegen_flags: <defaults>
</compile_context>

<pallas_src>
import jax
import jax.numpy as jnp
from jax.experimental import pallas as pl
from jax.experimental.pallas import tpu as pltpu


EPS = 1e-4
_VMEM_BUDGET_BYTES = 24 << 20   # conservative: fits default scoped VMEM on all gens
_MAX_BATCH_TILE = 1024


def _stable_softplus(x):
    # softplus(x) = max(x, 0) + log1p(exp(-|x|))   (VPU + EUP, numerically stable)
    return jnp.maximum(x, 0.0) + jnp.log1p(jnp.exp(-jnp.abs(x)))


def _mu_scale(x_ref, w_ref, b_ref):
    """Shared hot path: ReLU -> fused (E,2E) matmul -> bias -> slice -> softplus."""
    E = x_ref.shape[1]
    h = jnp.maximum(x_ref[...], 0.0)                             # ReLU       (VPU)
    y = jnp.dot(h.astype(w_ref.dtype), w_ref[...],               # fused dot  (MXU)
                preferred_element_type=jnp.float32) + b_ref[...]
    mu = y[:, :E]
    scale = _stable_softplus(y[:, E:]) + EPS                     # softplus   (VPU+EUP)
    return mu, scale


def _sampler_kernel_noise(x_ref, w_ref, b_ref, noise_ref, out_ref):
    # x_ref: (tb, E)  w_ref: (E, 2E)  b_ref: (1, 2E)  noise_ref/out_ref: (S, tb, E)
    mu, scale = _mu_scale(x_ref, w_ref, b_ref)
    out_ref[...] = mu[None, :, :] + scale[None, :, :] * noise_ref[...]


def _sampler_kernel_prng(seed_ref, x_ref, w_ref, b_ref, out_ref):
    # seed_ref: (1,) int32 scalar-prefetch in SMEM.
    mu, scale = _mu_scale(x_ref, w_ref, b_ref)
    # Decorrelate tiles by feeding the tile index as a second seed word
    # (avoids the "consecutive integer seed" correlation concern).
    pltpu.prng_seed(seed_ref[0], pl.program_id(0))
    noise = pltpu.stateful_normal(out_ref.shape, jnp.float32)    # (S, tb, E), no reshape
    out_ref[...] = mu[None, :, :] + scale[None, :, :] * noise


def _fuse_params(w_mu, b_mu, w_std, b_std, weight_dtype):
    E = w_mu.shape[0]
    w_cat = jnp.concatenate([w_mu, w_std], axis=1).astype(weight_dtype)     # (E, 2E)
    b_cat = jnp.concatenate([b_mu, b_std]).reshape(1, 2 * E).astype(jnp.float32)
    return w_cat, b_cat


def _batch_tile(B, S, E, *, batch_tile=None, noise_streamed=False):
    """Largest multiple-of-8 divisor of B that fits the VMEM budget, preferring
    >= 2 grid steps (v7x has 2 TensorCores).  Full-batch block only for tiny /
    non-multiple-of-8 batches."""
    if B < 8:
        return B                                   # full-extent block is always legal
    if batch_tile is not None and B % batch_tile == 0 and (
            batch_tile % 8 == 0 or batch_tile == B):
        return batch_tile

    # Streamed f32 bytes per batch row per grid step (double-buffered):
    #   x row (E) + out row (S*E) [+ noise row (S*E) on the parity path].
    row_bytes = 4 * (E + S * E * (2 if noise_streamed else 1))
    weight_bytes = 4 * (E * 2 * E + 2 * E)
    cap = (_VMEM_BUDGET_BYTES - 4 * weight_bytes) // (2 * row_bytes)
    cap = max(8, min(int(cap), _MAX_BATCH_TILE))

    # Prefer a tile that yields >= 2 grid steps; fall back to <= B.
    for limit in (min(cap, B // 2), min(cap, B)):
        t = (limit // 8) * 8
        while t >= 8:
            if B % t == 0:
                return t
            t -= 8
    # TODO(synk): B not a multiple of 8 — single full-batch block (masked-tail
    # grid would be needed to tile huge non-multiple-of-8 batches).
    return B


def _compiler_params():
    return pltpu.CompilerParams(
        dimension_semantics=("parallel",),
        vmem_limit_bytes=32 << 20,
    )


def sampler_forward(x, w_mu, b_mu, w_std, b_std,
                    *, n_samples=4, seed=0,
                    weight_dtype=jnp.float32, batch_tile=None):
    """PRIMARY path: N(0,1) noise generated in-kernel (no RNG dispatch, no
    noise HBM round trip).  RNG stream differs from jax.random / torch."""
    B, E = x.shape
    S = n_samples
    tb = _batch_tile(B, S, E, batch_tile=batch_tile, noise_streamed=False)
    w_cat, b_cat = _fuse_params(w_mu, b_mu, w_std, b_std, weight_dtype)
    seed_arr = jnp.asarray([seed], dtype=jnp.int32)

    grid_spec = pltpu.PrefetchScalarGridSpec(
        num_scalar_prefetch=1,                                   # seed lands in SMEM
        grid=(B // tb,),
        in_specs=[
            pl.BlockSpec((tb, E), lambda i, seed_ref: (i, 0)),       # x: streamed
            pl.BlockSpec((E, 2 * E), lambda i, seed_ref: (0, 0)),    # weights: resident
            pl.BlockSpec((1, 2 * E), lambda i, seed_ref: (0, 0)),    # bias: resident
        ],
        out_specs=pl.BlockSpec((S, tb, E), lambda i, seed_ref: (0, i, 0)),
    )
    return pl.pallas_call(
        _sampler_kernel_prng,
        out_shape=jax.ShapeDtypeStruct((S, B, E), jnp.float32),
        grid_spec=grid_spec,
        compiler_params=_compiler_params(),
    )(seed_arr, x, w_cat, b_cat)


def sampler_forward_with_noise(x, w_mu, b_mu, w_std, b_std, noise,
                               *, weight_dtype=jnp.float32, batch_tile=None):
    """Parity path: explicit N(0,1) noise (S, B, E) supplied by the caller.
    The noise buffer is donated to the output (do not reuse it afterwards)."""
    B, E = x.shape
    S = noise.shape[0]
    tb = _batch_tile(B, S, E, batch_tile=batch_tile, noise_streamed=True)
    w_cat, b_cat = _fuse_params(w_mu, b_mu, w_std, b_std, weight_dtype)

    grid_spec = pltpu.PrefetchScalarGridSpec(
        num_scalar_prefetch=0,
        grid=(B // tb,),
        in_specs=[
            pl.BlockSpec((tb, E), lambda i: (i, 0)),             # x: streamed
            pl.BlockSpec((E, 2 * E), lambda i: (0, 0)),          # fused weights: resident
            pl.BlockSpec((1, 2 * E), lambda i: (0, 0)),          # fused bias: resident
            pl.BlockSpec((S, tb, E), lambda i: (0, i, 0)),       # noise: streamed
        ],
        out_specs=pl.BlockSpec((S, tb, E), lambda i: (0, i, 0)),
    )
    return pl.pallas_call(
        _sampler_kernel_noise,
        out_shape=jax.ShapeDtypeStruct((S, B, E), jnp.float32),
        grid_spec=grid_spec,
        # noise and out share shape/dtype/block-mapping; donate the noise buffer.
        input_output_aliases={3: 0},
        compiler_params=_compiler_params(),
    )(x, w_cat, b_cat, noise)


def _reference(x, w_mu, b_mu, w_std, b_std, noise):
    h = jnp.maximum(x, 0.0)
    mu = h @ w_mu + b_mu
    scale = jax.nn.softplus(h @ w_std + b_std) + EPS
    return mu[None] + scale[None] * noise, mu, scale


if __name__ == "__main__":
    B, E, S = 32, 128, 4  # batch, embed_dim, n_samples

    key = jax.random.PRNGKey(0)
    kx, kwm, kbm, kws, kbs, kn = jax.random.split(key, 6)

    bound = 1.0 / (E ** 0.5)  # PyTorch-Linear-style uniform init bound
    x = jax.random.normal(kx, (B, E), dtype=jnp.float32)
    w_mu = jax.random.uniform(kwm, (E, E), jnp.float32, -bound, bound)
    b_mu = jax.random.uniform(kbm, (E,), jnp.float32, -bound, bound)
    w_std = jax.random.uniform(kws, (E, E), jnp.float32, -bound, bound)
    b_std = jax.random.uniform(kbs, (E,), jnp.float32, -bound, bound)
    noise = jax.random.normal(kn, (S, B, E), dtype=jnp.float32)

    # Reference first: the parity kernel donates the noise buffer.
    ref, mu_ref, scale_ref = _reference(x, w_mu, b_mu, w_std, b_std, noise)
    ref = jax.block_until_ready(ref)

    # 1) Parity path: explicit noise, f32 weights, auto-tiled grid (tb=16 -> 2 steps).
    out = sampler_forward_with_noise(x, w_mu, b_mu, w_std, b_std, noise)
    out = jax.block_until_ready(out)
    assert out.shape == (S, B, E)
    assert jnp.allclose(out, ref, atol=3e-5, rtol=3e-5), "mismatch vs reference"

    # 2) Primary PRNG path: TPU-only (pltpu.prng_seed has no CPU/interpret lowering).
    if jax.default_backend() == "tpu" and hasattr(pltpu, "stateful_normal"):
        out2 = sampler_forward(x, w_mu, b_mu, w_std, b_std, n_samples=S, seed=1234)
        out2 = jax.block_until_ready(out2)
        assert out2.shape == (S, B, E)
        z = (out2 - mu_ref[None]) / scale_ref[None]   # implied standard-normal draws
        assert bool(jnp.all(jnp.isfinite(z)))
        assert abs(float(z.mean())) < 0.2 and 0.8 < float(z.std()) < 1.2

    # 3) Optional bf16-weight path (accuracy knob, not a perf lever).
    noise2 = jax.random.normal(jax.random.PRNGKey(7), (S, B, E), jnp.float32)
    ref2, _, _ = _reference(x, w_mu, b_mu, w_std, b_std, noise2)
    ref2 = jax.block_until_ready(ref2)
    out3 = sampler_forward_with_noise(x, w_mu, b_mu, w_std, b_std, noise2,
                                      weight_dtype=jnp.bfloat16)
    out3 = jax.block_until_ready(out3)
    assert jnp.allclose(out3, ref2, atol=0.1, rtol=0.1), "bf16 path too far off"

    print("KERNEL_OK")
</pallas_src>

<mosaic_0001>
module attributes {stable_mosaic.version = 11 : i64} {
  func.func @_sampler_kernel_noise(%arg0: i32, %arg1: memref<16x128xf32, #tpu.memory_space<vmem>>, %arg2: memref<128x256xf32, #tpu.memory_space<vmem>>, %arg3: memref<1x256xf32, #tpu.memory_space<vmem>>, %arg4: memref<4x16x128xf32, #tpu.memory_space<vmem>>, %arg5: memref<4x16x128xf32, #tpu.memory_space<vmem>>) attributes {dimension_semantics = [#tpu.dimension_semantics<parallel>], iteration_bounds = array<i64: 2>, scalar_prefetch = 0 : i64, scratch_operands = 0 : i64, tpu.core_type = #tpu.core_type<tc>, window_params = [{transform_indices = @transform_0, window_bounds = array<i64: 16, 128>}, {pipeline_mode = #tpu.pipeline_mode<synchronous>, transform_indices = @transform_1, window_bounds = array<i64: 128, 256>}, {pipeline_mode = #tpu.pipeline_mode<synchronous>, transform_indices = @transform_2, window_bounds = array<i64: 1, 256>}, {transform_indices = @transform_3, window_bounds = array<i64: 4, 16, 128>}, {transform_indices = @transform_4, window_bounds = array<i64: 4, 16, 128>}]} {
    %c0 = arith.constant 0 : index
    %c0_0 = arith.constant 0 : index
    %0 = vector.load %arg1[%c0, %c0_0] : memref<16x128xf32, #tpu.memory_space<vmem>>, vector<16x128xf32>
    %cst = arith.constant 0.000000e+00 : f32
    %1 = vector.broadcast %cst : f32 to vector<16x128xf32>
    %2 = arith.maximumf %0, %1 : vector<16x128xf32>
    %c0_1 = arith.constant 0 : index
    %c0_2 = arith.constant 0 : index
    %3 = vector.load %arg2[%c0_1, %c0_2] : memref<128x256xf32, #tpu.memory_space<vmem>>, vector<128x256xf32>
    %cst_3 = arith.constant dense<0.000000e+00> : vector<16x256xf32>
    %4 = tpu.matmul %2, %3, %cst_3 {dimension_numbers = #tpu.dot_dimension_numbers<[1], [0], [0], [1], [0, 0, 1, 1], [], []>} : vector<16x128xf32>, vector<128x256xf32>, vector<16x256xf32> -> vector<16x256xf32>
    %c0_4 = arith.constant 0 : index
    %c0_5 = arith.constant 0 : index
    %5 = vector.load %arg3[%c0_4, %c0_5] : memref<1x256xf32, #tpu.memory_space<vmem>>, vector<1x256xf32>
    %6 = vector.broadcast %5 : vector<1x256xf32> to vector<16x256xf32>
    %7 = arith.addf %4, %6 : vector<16x256xf32>
    %8 = vector.extract_strided_slice %7 {offsets = [0, 0], sizes = [16, 128], strides = [1, 1]} : vector<16x256xf32> to vector<16x128xf32>
    %9 = vector.extract_strided_slice %7 {offsets = [0, 128], sizes = [16, 128], strides = [1, 1]} : vector<16x256xf32> to vector<16x128xf32>
    %cst_6 = arith.constant 0.000000e+00 : f32
    %10 = vector.broadcast %cst_6 : f32 to vector<16x128xf32>
    %11 = arith.maximumf %9, %10 : vector<16x128xf32>
    %12 = math.absf %9 : vector<16x128xf32>
    %cst_7 = arith.constant 0.000000e+00 : f32
    %13 = vector.broadcast %cst_7 : f32 to vector<16x128xf32>
    %14 = arith.subf %13, %12 : vector<16x128xf32>
    %15 = math.exp %14 : vector<16x128xf32>
    %16 = math.log1p %15 : vector<16x128xf32>
    %17 = arith.addf %11, %16 : vector<16x128xf32>
    %cst_8 = arith.constant 9.99999974E-5 : f32
    %18 = vector.broadcast %cst_8 : f32 to vector<16x128xf32>
    %19 = arith.addf %17, %18 : vector<16x128xf32>
    %20 = vector.shape_cast %8 : vector<16x128xf32> to vector<1x16x128xf32>
    %21 = vector.shape_cast %19 : vector<16x128xf32> to vector<1x16x128xf32>
    %c0_9 = arith.constant 0 : index
    %c0_10 = arith.constant 0 : index
    %c0_11 = arith.constant 0 : index
    %22 = vector.load %arg4[%c0_9, %c0_10, %c0_11] : memref<4x16x128xf32, #tpu.memory_space<vmem>>, vector<4x16x128xf32>
    %23 = vector.broadcast %21 : vector<1x16x128xf32> to vector<4x16x128xf32>
    %24 = arith.mulf %23, %22 : vector<4x16x128xf32>
    %25 = vector.broadcast %20 : vector<1x16x128xf32> to vector<4x16x128xf32>
    %26 = arith.addf %25, %24 : vector<4x16x128xf32>
    %c0_12 = arith.constant 0 : index
    %c0_13 = arith.constant 0 : index
    %c0_14 = arith.constant 0 : index
    %27 = vector.load %arg5[%c0_12, %c0_13, %c0_14] : memref<4x16x128xf32, #tpu.memory_space<vmem>>, vector<4x16x128xf32>
    tpu.vector_store %arg5[%c0_12, %c0_13, %c0_14], %26 {strides = array<i32>} : memref<4x16x128xf32, #tpu.memory_space<vmem>>, vector<4x16x128xf32>,
    return
  }
  func.func @transform_0(%arg0: i32) -> (i32, i32) {
    %c0_i32 = arith.constant 0 : i32
    %c0_i32_0 = arith.constant 0 : i32
    return %arg0, %c0_i32 : i32, i32
  }
  func.func @transform_1(%arg0: i32) -> (i32, i32) {
    %c0_i32 = arith.constant 0 : i32
    %c0_i32_0 = arith.constant 0 : i32
    %c0_i32_1 = arith.constant 0 : i32
    return %c0_i32, %c0_i32_0 : i32, i32
  }
  func.func @transform_2(%arg0: i32) -> (i32, i32) {
    %c0_i32 = arith.constant 0 : i32
    %c0_i32_0 = arith.constant 0 : i32
    %c0_i32_1 = arith.constant 0 : i32
    return %c0_i32, %c0_i32_0 : i32, i32
  }
  func.func @transform_3(%arg0: i32) -> (i32, i32, i32) {
    %c0_i32 = arith.constant 0 : i32
    %c0_i32_0 = arith.constant 0 : i32
    %c0_i32_1 = arith.constant 0 : i32
    return %c0_i32, %arg0, %c0_i32_0 : i32, i32, i32
  }
  func.func @transform_4(%arg0: i32) -> (i32, i32, i32) {
    %c0_i32 = arith.constant 0 : i32
    %c0_i32_0 = arith.constant 0 : i32
    %c0_i32_1 = arith.constant 0 : i32
    return %c0_i32, %arg0, %c0_i32_0 : i32, i32, i32
  }
}

</mosaic_0001>

<bundles_post_ra>
// kernel: tpu_custom_call.1
= control target key start
LH: loop header
LB: loop body
LE: loop exit
PB: predicated region body
PF: predicated region fallthrough
CT: control target
= control target key end

     0   :  { %9 = vsyncpa [#allocation3], 0  ;;  %s1168_s0 = inlined_call_operand.hbm [shape: f32[32,128], index: 0, kind: input, shape index: {}]   ;;  %s1169_s1 = inlined_call_operand.vmem [shape: f32[128,256], index: 1, kind: input, shape index: {}]   ;;  %s1170_s2 = inlined_call_operand.vmem [shape: f32[1,256], index: 2, kind: input, shape index: {}]   ;;  %s1171_s3 = inlined_call_operand.hbm [shape: f32[4,32,128], index: 3, kind: input, shape index: {}, may-alias: {3,4}]   ;;  %s1172_s4 = inlined_call_operand.hbm [shape: f32[4,32,128], index: 4, kind: output, shape index: {}, may-alias: {3,4}]  }
   0x1   :  { %11 = vsyncpa [#allocation3 + $0x1], 0 }
   0x2   :  { %12 = vsyncpa [#allocation6], 0 }
   0x3   :  { %14 = vsyncpa [#allocation6 + $0x1], 0 }
   0x4   :  { %15 = vsyncpa [#allocation4], 0 }
   0x5   :  { %17 = vsyncpa [#allocation4 + $0x1], 0  ;;  %s877_s15 = smov 0   ;;  %s879_s16 = smov 0  }
   0x6   :  { %s881_s17 = smov 0   ;;  %s883_s18 = smov 0  }
   0x7 LB: > { %s898_s19 = sadd.s32 4294967295, %s833_s18   ;;  %s612_s20 = sadd.s32 4294967294, %s833_s18   ;;  %s833_s18 = sphi %s883_s18, %s1185_s18   ;;  %s829_s17 = sphi %s881_s17, %s1184_s17   ;;  %s825_s16 = sphi %s879_s16, %s1183_s16   ;;  %s821_s15 = sphi %s877_s15, %s1182_s15  }
   0x8   : > { %s902_s21 = sadd.s32 1, %s833_s18   ;;  %s30_s22 = sadd.s32 1, %s829_s17 }
   0x9   : > { %s27_s23 = ssub.s32 %s833_s18, %s902_s21  ;;  %p37_p0 = scmp.ne.s32.totalorder %s829_s17, %s825_s16 }
   0xa   : > { %p28_p1 = scmp.eq.s32.totalorder %s27_s23, 0  ;;  %p38_p2 = scmp.eq.s32.totalorder %s833_s18, 0 }
   0xb   : > { %p43_p3 = scmp.ne.s32.totalorder %s825_s16, %s821_s15  ;;  %p44_p4 = scmp.eq.s32.totalorder %s898_s19, 0 }
   0xc   : > { %s914_s24 = scalar_select %p28_p1, %s829_s17, %s30_s22  }
   0xd   : > { %p916_p5 = por %p38_p2, %p37_p0  ;;  %p920_p6 = por %p44_p4, %p43_p3 }
   0xe   : > { %p135_p7 = scmp.eq.s32.totalorder %s898_s19, 1  ;;  %p141_p8 = scmp.eq.s32.totalorder %s612_s20, 1 }
   0xf   : > { %p1173_p11 = scmp.ge.s32.totalorder %s833_s18, 2 }
  0x10   : > { %p925_p9 = por %p135_p7, %p37_p0  ;;  %p929_p10 = por %p141_p8, %p43_p3 }
  0x11   : > { %163 = sbr.rel (%p1173_p11) target bundleno = 58 (0x3a), region = 24  ;;  %s937_s29 = sand.u32 (!%p1173_p11), 1, %s829_s17  }
  0x12   : > { %s1177_s27 = scalar_select %p925_p9, 1, 0 }
  0x13   : > { %s1178_s28 = scalar_select %p929_p10, 1, 0 }
  0x14   : > { %s632_s30 = sshll.u32 (!%p1173_p11), %s833_s18, 8  ;;  %s615_s5 = sshll.u32 (!%p1173_p11), %s937_s29, 4 }
  0x15   : > { %s946_s8 = scalar_lea.hbm (!%p1173_p11), %s1168_s0, %s632_s30  ;;  %s171_s9 = scalar_lea.vmem (!%p1173_p11), [#allocation2], %s615_s5 }
  0x16   : > { %s178_s10 = sshll.u32 (!%p1173_p11), %s171_s9, 4  ;;  %s168_s11 = scalar_lea.sflag (!%p1173_p11), [#allocation3], %s937_s29  ;;  %s948_s10 = int_to_ptr.vmem [resolvable:$true] %s178_s10 }
  0x17   : > { %s763_s12 = scalar_lea.hbm (!%p1173_p11), %s946_s8, 256  ;;  %s767_s20 = scalar_lea.hbm (!%p1173_p11), %s1168_s0, 512 }
  0x18   : > { %p764_p12 = scmp.ne.s32.totalorder %s946_s8, %s763_s12  ;;  %p768_p1 = scmp.lt.u32.totalorder %s946_s8, %s1168_s0 }
  0x19   : > { %p769_p2 = scmp.lt.u32.totalorder %s767_s20, %s763_s12  ;;  %p771_p4 = scmp.lt.u32.totalorder %s763_s12, %s946_s8 }
  0x1a   : > { %p765_p13 = pnand %p764_p12, %p916_p5 }
  0x1b   : > { %p770_p3 = por %p769_p2, %p768_p1 }
  0x1c   : > { %p766_p0 = pneg %p765_p13 }
  0x1d   : > { %p772_p7 = por %p771_p4, %p770_p3 }
  0x1f   : > { %p773_p8 = pnand %p772_p7, %p766_p0 }
  0x21   : > { %776 = shalt.err (!%p773_p8)
}
  0x22   : > { %s777_s5 = scalar_lea.vmem %s948_s10, 256  ;;  %s835_s6 = smov [#allocation2]  }
  0x23   : > { %p778_p12 = scmp.ne.s32.totalorder %s948_s10, %s777_s5  ;;  %s781_s7 = sshll.u32 %s835_s6, 4  ;;  %s782_s7 = int_to_ptr.vmem [resolvable:$false] %s781_s7 }
  0x24   : > { %s783_s9 = scalar_lea.vmem %s782_s7, 512  ;;  %p784_p10 = scmp.lt.s32.totalorder %s948_s10, %s782_s7 }
  0x25   : > { %p779_p13 = pnand %p778_p12, %p916_p5  ;;  %p785_p9 = scmp.lt.s32.totalorder %s783_s9, %s777_s5 }
  0x27   : > { %p780_p11 = pneg %p779_p13  ;;  %p786_p1 = por %p785_p9, %p784_p10 }
  0x29   : > { %p787_p2 = pnand %p786_p1, %p780_p11 }
  0x2b   : > { %790 = shalt.err (!%p787_p2)
}
  0x2c   : > { %s836_s12 = smov 128   ;;  %s837_s13 = smov 8  }
  0x2d   : > { %683 = dma.hbm_to_vmem [thread:$0]  (%p916_p5), %s946_s8, 256, %s948_s10, %s168_s11, %s836_s12, %s836_s12, %s837_s13  }
  0x2e   : > { %s618_s14 = sshll.u32 %s937_s29, 6  ;;  %s198_s23 = scalar_lea.hbm %s1171_s3, %s632_s30 }
  0x2f   : > { %s684_s5 = scalar_select %p916_p5, [#allocation0], [#allocation12] }
  0x30   : > { %s192_s6 = scalar_lea.vmem [#allocation5], %s618_s14  ;;  %s838_s10 = smov 512  }
  0x31   : > { %s211_s7 = sshll.u32 %s192_s6, 4  ;;  %s203_s8 = sld [smem:[%s684_s5]]   ;;  %s212_s7 = int_to_ptr.vmem [resolvable:$true] %s211_s7 }
  0x32   : > { %685 = sst [smem:[#allocation9]] (%p916_p5), %s838_s10  ;;  %s839_s11 = smov 256  }
  0x33   : > { %686 = sst [smem:[#allocation9 + $0x1]] (%p916_p5), %s839_s11  ;;  %s840_s9 = smov 2  }
  0x34   : > { %687 = sst [smem:[#allocation9 + $0x2]] (%p916_p5), %s840_s9  ;;  %s841_s12 = smov 128  }
  0x35   : > { %688 = sst [smem:[#allocation9 + $0x3]] (%p916_p5), %s841_s12  ;;  %s842_s13 = smov 8  }
  0x36   : > { %689 = sst [smem:[#allocation9 + $0x4]] (%p916_p5), %s841_s12  ;;  %s189_s20 = scalar_lea.sflag [#allocation6], %s937_s29 }
  0x37   : > { %s621_s30 = sshll.u32 %s203_s8, 26  ;;  %690 = sst [smem:[#allocation9 + $0x5]] (%p916_p5), %s842_s13 }
  0x38   : > { %s622_s14 = sadd.s32 134217728, %s621_s30  ;;  %s843_s22 = smov [#allocation8]  }
  0x39   : > { %691 = dma.general (%p916_p5), %s198_s23, 1024, %s212_s7, %s189_s20, %s843_s22, [#allocation9], %s622_s14, 0  }
  0x3a PF: > { %p623_p9 = scmp.ge.s32.totalorder %s833_s18, 1  ;;  %p232_p10 = scmp.lt.s32.totalorder %s833_s18, 3 }
  0x3c   : > { %p233_p11 = pnand %p623_p9, %p232_p10 }
  0x3d   : > { %s1000_s5 = sand.u32 (!%p233_p11), 1, %s825_s16  }
  0x3e   : > { %236 = sbr.rel (%p233_p11) target bundleno = 379 (0x17b), region = 36  ;;  %s624_s6 = sshll.u32 (!%p233_p11), %s1000_s5, 4 }
  0x3f   : > { %s239_s8 = scalar_lea.sflag (!%p233_p11), [#allocation3], %s1000_s5  ;;  %s1004_s10 = scalar_lea.vmem (!%p233_p11), [#allocation2], %s624_s6 }
  0x45   : > { %808 = dma.done.wait (%p920_p6), %s239_s8, 256  }
  0x46   : > { %810 = vsyncadd (%p920_p6), %s239_s8, 4294967040  ;;  %s625_s25 = sshll.u32 %s1000_s5, 6  ;;  %s248_s29 = scalar_lea.sflag [#allocation6], %s1000_s5 }
  0x47   : > { %s1014_s23 = scalar_lea.vmem [#allocation5], %s625_s25 }
  0x48   : > { %812 = dma.done.wait (%p920_p6), %s248_s29, 1024  }
  0x49   : > { %814 = vsyncadd (%p920_p6), %s248_s29, 4294966272  ;;  %v844_v0 = vmov 0.0   ;;  %v289_v1 = vld [vmem:[%s1169_s1 + $0x8] sm:$0xff]  ;;  %v291_v2 = vld [vmem:[%s1169_s1 + $0x18] sm:$0xff]  ;;  %v322_v53 = vlaneseq }
  0x4a   : > { %396 = vmatprep.mubr.f32.mxu0 %v844_v0  ;;  %402 = vmatprep.mubr.f32.mxu1 %v844_v0  ;;  %v288_v3 = vld [vmem:[%s1169_s1] sm:$0xff]  ;;  %v635_v4 = vpack.c.bf16 %v291_v2, %v289_v1  ;;  %v290_v5 = vld [vmem:[%s1169_s1 + $0x10] sm:$0xff]  ;;  %v293_v6 = vld [vmem:[%s1169_s1 + $0x28] sm:$0xff] }
  0x4b   : > { %v295_v7 = vld [vmem:[%s1169_s1 + $0x38] sm:$0xff]  ;;  %v637_v8 = vpack.c.bf16 %v290_v5, %v288_v3  ;;  %v292_v10 = vld [vmem:[%s1169_s1 + $0x20] sm:$0xff]  ;;  %v294_v11 = vld [vmem:[%s1169_s1 + $0x30] sm:$0xff]  ;;  %v323_v54 = vshrl.u32 %v322_v53, 7 }
  0x4c   : > { %v639_v9 = vpack.c.bf16 %v295_v7, %v293_v6  ;;  %v297_v12 = vld [vmem:[%s1169_s1 + $0x48] sm:$0xff]  ;;  %636 = vmatprep.subr.bf16.mxu0 %v635_v4  ;;  %667 = vmatprep.subr.bf16.mxu1 %v635_v4  ;;  %v299_v13 = vld [vmem:[%s1169_s1 + $0x58] sm:$0xff]  ;;  %v641_v14 = vpack.c.bf16 %v294_v11, %v292_v10  ;;  %v296_v16 = vld [vmem:[%s1169_s1 + $0x40] sm:$0xff] }
  0x4d   : > { %638 = vmatpush1.bf16.msra.mxu0 %v637_v8  ;;  %675 = vmatpush1.bf16.msra.mxu1 %v637_v8  ;;  %v643_v15 = vpack.c.bf16 %v299_v13, %v297_v12  ;;  %v298_v17 = vld [vmem:[%s1169_s1 + $0x50] sm:$0xff]  ;;  %v301_v18 = vld [vmem:[%s1169_s1 + $0x68] sm:$0xff]  ;;  %v303_v19 = vld [vmem:[%s1169_s1 + $0x78] sm:$0xff]  ;;  %v328_v55 = vsub.s32 1, %v323_v54 }
  0x4e   : > { %640 = vmatprep.subr.bf16.mxu0 %v639_v9  ;;  %668 = vmatprep.subr.bf16.mxu1 %v639_v9  ;;  %v645_v20 = vpack.c.bf16 %v298_v17, %v296_v16  ;;  %v647_v21 = vpack.c.bf16 %v303_v19, %v301_v18  ;;  %v300_v22 = vld [vmem:[%s1169_s1 + $0x60] sm:$0xff]  ;;  %v302_v23 = vld [vmem:[%s1169_s1 + $0x70] sm:$0xff]  ;;  %v305_v24 = vld [vmem:[%s1169_s1 + $0x88] sm:$0xff] }
  0x4f   : > { %v307_v25 = vld [vmem:[%s1169_s1 + $0x98] sm:$0xff]  ;;  %v649_v26 = vpack.c.bf16 %v302_v23, %v300_v22  ;;  %v304_v28 = vld [vmem:[%s1169_s1 + $0x80] sm:$0xff]  ;;  %v306_v29 = vld [vmem:[%s1169_s1 + $0x90] sm:$0xff] }
  0x50   : > { %v651_v27 = vpack.c.bf16 %v307_v25, %v305_v24  ;;  %v309_v30 = vld [vmem:[%s1169_s1 + $0xa8] sm:$0xff]  ;;  %v311_v31 = vld [vmem:[%s1169_s1 + $0xb8] sm:$0xff]  ;;  %v653_v32 = vpack.c.bf16 %v306_v29, %v304_v28  ;;  %v308_v34 = vld [vmem:[%s1169_s1 + $0xa0] sm:$0xff] }
  0x51   : > { %642 = vmatpush1.bf16.msra.mxu0 %v641_v14  ;;  %676 = vmatpush1.bf16.msra.mxu1 %v641_v14  ;;  %v655_v33 = vpack.c.bf16 %v311_v31, %v309_v30  ;;  %v310_v35 = vld [vmem:[%s1169_s1 + $0xb0] sm:$0xff]  ;;  %v313_v36 = vld [vmem:[%s1169_s1 + $0xc8] sm:$0xff]  ;;  %v315_v37 = vld [vmem:[%s1169_s1 + $0xd8] sm:$0xff] }
  0x52   : > { %644 = vmatprep.subr.bf16.mxu0 %v643_v15  ;;  %669 = vmatprep.subr.bf16.mxu1 %v643_v15  ;;  %v657_v38 = vpack.c.bf16 %v310_v35, %v308_v34  ;;  %v659_v39 = vpack.c.bf16 %v315_v37, %v313_v36  ;;  %v312_v40 = vld [vmem:[%s1169_s1 + $0xc0] sm:$0xff]  ;;  %v314_v41 = vld [vmem:[%s1169_s1 + $0xd0] sm:$0xff]  ;;  %v317_v42 = vld [vmem:[%s1169_s1 + $0xe8] sm:$0xff]  ;;  %v324_v15 = vsub.s32 0, %v323_v54 }
  0x53   : > { %v319_v43 = vld [vmem:[%s1169_s1 + $0xf8] sm:$0xff]  ;;  %v661_v44 = vpack.c.bf16 %v314_v41, %v312_v40  ;;  %v316_v46 = vld [vmem:[%s1169_s1 + $0xe0] sm:$0xff]  ;;  %v318_v47 = vld [vmem:[%s1169_s1 + $0xf0] sm:$0xff] }
  0x54   : > { %v663_v45 = vpack.c.bf16 %v319_v43, %v317_v42  ;;  %v665_v48 = vpack.c.bf16 %v318_v47, %v316_v46  ;;  %v284_v49 = vld [vmem:[%s1004_s10] sm:$0xff]  ;;  %v285_v50 = vld [vmem:[%s1004_s10 + $0x8] sm:$0xff]  ;;  %s280_s10 = scalar_lea.vmem [#allocation7], %s625_s25 }
  0x55   : > { %646 = vmatpush1.bf16.msra.mxu0 %v645_v20  ;;  %677 = vmatpush1.bf16.msra.mxu1 %v645_v20  ;;  %v286_v51 = vmax.f32 %v284_v49, 0.0  ;;  %v287_v52 = vmax.f32 %v285_v50, 0.0  ;;  %v320_v56 = vld [vmem:[%s1170_s2] sm:$0x3]  ;;  %v443_v29 = vld [vmem:[%s1014_s23 + $0x10] sm:$0xff]  ;;  %v442_v34 = vld [vmem:[%s1014_s23 + $0x8] sm:$0xff] }
  0x56   : > { %648 = vmatprep.subr.bf16.mxu0 %v647_v21  ;;  %670 = vmatprep.subr.bf16.mxu1 %v647_v21  ;;  %v329_v57 = vrot.slane %v320_v56, %v328_v55  ;;  %v325_v24 = vrot.slane %v320_v56, %v324_v15  ;;  %v441_v28 = vld [vmem:[%s1014_s23] sm:$0xff]  ;;  %v444_v36 = vld [vmem:[%s1014_s23 + $0x18] sm:$0xff]  ;;  %v446_v37 = vld [vmem:[%s1014_s23 + $0x28] sm:$0xff] }
  0x57   : > { %v445_v31 = vld [vmem:[%s1014_s23 + $0x20] sm:$0xff] }
  0x59   : > { %650 = vmatpush1.bf16.msra.mxu0 %v649_v26  ;;  %678 = vmatpush1.bf16.msra.mxu1 %v649_v26 }
  0x5a   : > { %652 = vmatprep.subr.bf16.mxu0 %v651_v27  ;;  %671 = vmatprep.subr.bf16.mxu1 %v651_v27 }
  0x5d   : > { %654 = vmatpush1.bf16.msra.mxu0 %v653_v32  ;;  %679 = vmatpush1.bf16.msra.mxu1 %v653_v32  ;;  %v447_v32 = vld [vmem:[%s1014_s23 + $0x30] sm:$0xff] }
  0x5e   : > { %656 = vmatprep.subr.bf16.mxu0 %v655_v33  ;;  %672 = vmatprep.subr.bf16.mxu1 %v655_v33 }
  0x61   : > { %658 = vmatpush1.bf16.msra.mxu0 %v657_v38  ;;  %680 = vmatpush1.bf16.msra.mxu1 %v657_v38  ;;  %v448_v38 = vld [vmem:[%s1014_s23 + $0x38] sm:$0xff]  ;;  %s474_s23 = scalar_lea.sflag [#allocation4], %s1000_s5 }
  0x62   : > { %660 = vmatprep.subr.bf16.mxu0 %v659_v39  ;;  %673 = vmatprep.subr.bf16.mxu1 %v659_v39 }
  0x65   : > { %662 = vmatpush1.bf16.msra.mxu0 %v661_v44  ;;  %681 = vmatpush1.bf16.msra.mxu1 %v661_v44 }
  0x66   : > { %664 = vmatprep.subr.bf16.mxu0 %v663_v45  ;;  %674 = vmatprep.subr.bf16.mxu1 %v663_v45 }
  0x69   : > { %666 = vmatpush1.bf16.msra.mxu0 %v665_v48  ;;  %682 = vmatpush1.bf16.msra.mxu1 %v665_v48 }
  0x6c   : > { %397 = vmatmul.mubr.f32.vlgmr.msra.gmra.mrb[0].mxu0 %v286_v51  ;;  %403 = vmatmul.mubr.f32.vlgmr.msra.gmra.mrb[0].mxu1 %v287_v52 }
 0x13f   : > { %v398_v58 = vpop.f32.mrb[0].mxu0  ;;  %v404_v59 = vpop.f32.mrb[0].mxu1 }
 0x140   : > { %v400_v60 = vpop.f32.mrb[1].mxu0  ;;  %v406_v61 = vpop.f32.mrb[1].mxu1  ;;  %v399_v39 = vadd.f32 %v398_v58, %v325_v24  ;;  %v405_v40 = vadd.f32 %v404_v59, %v325_v24 }
 0x141   : > { %v401_v62 = vadd.f32 %v400_v60, %v329_v57  ;;  %v407_v63 = vadd.f32 %v406_v61, %v329_v57 }
 0x143   : > { %v411_v0 = vand.u32 2147483647, %v401_v62  ;;  %v412_v1 = vand.u32 2147483647, %v407_v63  ;;  %v409_v21 = vmax.f32 %v401_v62, 0.0  ;;  %v410_v26 = vmax.f32 %v407_v63, 0.0 }
 0x145   : > { %v413_v2 = vsub.f32 0.0, %v411_v0  ;;  %v414_v3 = vsub.f32 0.0, %v412_v1 }
 0x147   : > { %v415_v4 = vmul.f32 1.442695, %v413_v2  ;;  %v417_v5 = vmul.f32 1.442695, %v414_v3 }
 0x149   : > { %755 = vpow2.f32 %v415_v4 }
 0x14a   : > { %757 = vpow2.f32 %v417_v5 }
 0x153   : > { %v756_v6 = vpop.eup %755 }
 0x154   : > { %v758_v7 = vpop.eup %757  ;;  %v419_v8 = vadd.f32 1.0, %v756_v6  ;;  %v422_v10 = vmul.f32 -0.5, %v756_v6  ;;  %v425_v13 = vand.u32 2147483647, %v756_v6 }
 0x155   : > { %v428_v9 = vadd.f32 1.0, %v758_v7  ;;  %v431_v11 = vmul.f32 -0.5, %v758_v7  ;;  %v434_v16 = vand.u32 2147483647, %v758_v7 }
 0x156   : > { %759 = vlog2.f32 %v419_v8  ;;  %v423_v12 = vadd.f32 1.0, %v422_v10  ;;  %vm426_vm0 = vcmp.lt.f32.partialorder %v425_v13, 0.0004427343 }
 0x157   : > { %761 = vlog2.f32 %v428_v9  ;;  %v432_v14 = vadd.f32 1.0, %v431_v11  ;;  %vm435_vm1 = vcmp.lt.f32.partialorder %v434_v16, 0.0004427343 }
 0x158   : > { %v424_v20 = vmul.f32 %v756_v6, %v423_v12 }
 0x159   : > { %v433_v23 = vmul.f32 %v758_v7, %v432_v14 }
 0x160   : > { %v760_v17 = vpop.eup %759 }
 0x161   : > { %v762_v18 = vpop.eup %761  ;;  %v421_v19 = vmul.f32 0.6931472, %v760_v17 }
 0x162   : > { %v430_v22 = vmul.f32 0.6931472, %v762_v18 }
 0x163   : > { %v427_v25 = vsel %vm426_vm0, %v424_v20, %v421_v19 }
 0x164   : > { %v437_v27 = vadd.f32 %v427_v25, %v409_v21  ;;  %v436_v30 = vsel %vm435_vm1, %v433_v23, %v430_v22 }
 0x165   : > { %v438_v33 = vadd.f32 %v436_v30, %v410_v26 }
 0x166   : > { %v439_v35 = vadd.f32 0.0001, %v437_v27 }
 0x167   : > { %v440_v41 = vadd.f32 0.0001, %v438_v33 }
 0x168   : > { %v449_v42 = vmul.f32 %v441_v28, %v439_v35  ;;  %v451_v43 = vmul.f32 %v443_v29, %v439_v35  ;;  %v453_v44 = vmul.f32 %v445_v31, %v439_v35  ;;  %v455_v45 = vmul.f32 %v447_v32, %v439_v35 }
 0x169   : > { %v450_v46 = vmul.f32 %v442_v34, %v440_v41  ;;  %v452_v47 = vmul.f32 %v444_v36, %v440_v41  ;;  %v454_v48 = vmul.f32 %v446_v37, %v440_v41  ;;  %v456_v49 = vmul.f32 %v448_v38, %v440_v41 }
 0x16a   : > { %v457_v50 = vadd.f32 %v449_v42, %v399_v39  ;;  %v459_v51 = vadd.f32 %v451_v43, %v399_v39  ;;  %v461_v52 = vadd.f32 %v453_v44, %v399_v39  ;;  %v463_v53 = vadd.f32 %v455_v45, %v399_v39 }
 0x16b   : > { %v458_v54 = vadd.f32 %v450_v46, %v405_v40  ;;  %v460_v55 = vadd.f32 %v452_v47, %v405_v40  ;;  %v462_v56 = vadd.f32 %v454_v48, %v405_v40  ;;  %v464_v57 = vadd.f32 %v456_v49, %v405_v40 }
 0x16c   : > { %465 = vst [vmem:[%s280_s10] sm:$0xff] %v457_v50  ;;  %467 = vst [vmem:[%s280_s10 + $0x10] sm:$0xff] %v459_v51 }
 0x16d   : > { %469 = vst [vmem:[%s280_s10 + $0x20] sm:$0xff] %v461_v52  ;;  %471 = vst [vmem:[%s280_s10 + $0x30] sm:$0xff] %v463_v53 }
 0x16e   : > { %466 = vst [vmem:[%s280_s10 + $0x8] sm:$0xff] %v458_v54  ;;  %468 = vst [vmem:[%s280_s10 + $0x18] sm:$0xff] %v460_v55 }
 0x16f   : > { %470 = vst [vmem:[%s280_s10 + $0x28] sm:$0xff] %v462_v56  ;;  %472 = vst [vmem:[%s280_s10 + $0x38] sm:$0xff] %v464_v57 }
 0x170   : > { %s634_s11 = sshll.u32 %s898_s19, 8  ;;  %s503_s9 = sshll.u32 %s280_s10, 4  ;;  %s504_s9 = int_to_ptr.vmem [resolvable:$true] %s503_s9 }
 0x171   : > { %s486_s30 = scalar_lea.hbm %s1172_s4, %s634_s11  ;;  %s845_s13 = smov 256  }
 0x172   : > { %p1179_p5 = scmp.ne.s32.totalorder %s1177_s27, 0  ;;  %s846_s14 = smov 512  }
 0x173   : > { %s847_s5 = smov 2   ;;  %s848_s20 = smov 128  }
 0x174   : > { %694 = sst [smem:[#allocation11]] (%p1179_p5), %s845_s13  ;;  %s849_s19 = smov 8  }
 0x175   : > { %695 = sst [smem:[#allocation11 + $0x1]] (%p1179_p5), %s846_s14  ;;  %s850_s26 = smov [#allocation10]  }
 0x176   : > { %696 = sst [smem:[#allocation11 + $0x2]] (%p1179_p5), %s847_s5  ;;  %s851_s22 = smov 0  }
 0x177   : > { %697 = sst [smem:[#allocation11 + $0x3]] (%p1179_p5), %s848_s20 }
 0x178   : > { %698 = sst [smem:[#allocation11 + $0x4]] (%p1179_p5), %s848_s20 }
 0x179   : > { %699 = sst [smem:[#allocation11 + $0x5]] (%p1179_p5), %s849_s19 }
 0x17a   : > { %700 = dma.general (%p1179_p5), %s504_s9, 1024, %s486_s30, %s474_s23, %s850_s26, [#allocation11], %s851_s22, 0  }
 0x17b PF: > { %s531_s6 = sand.u32 1, %s821_s15   ;;  %p1180_p6 = scmp.ne.s32.totalorder %s1178_s28, 0 }
 0x17c   : > { %p1181_p0 = scmp.ge.s32.totalorder %s833_s18, 2  ;;  %s532_s8 = scalar_lea.sflag [#allocation4], %s531_s6 }
 0x17e   : > { %p703_p3 = pnand %p1181_p0, %p1180_p6 }
 0x180   : > { %816 = dma.done.wait (!%p703_p3), %s532_s8, 1024  }
 0x181   : > { %818 = vsyncadd (!%p703_p3), %s532_s8, 4294966272  ;;  %p20_p4 = scmp.ge.s32.totalorder %s902_s21, 4   ;;  %s1182_s15 = smov %s825_s16 }
 0x182   : > { %s1183_s16 = smov %s829_s17  ;;  %s1184_s17 = smov %s914_s24 }
 0x183   : > { %s1185_s18 = smov %s902_s21  ;;  %22 = sbr.rel (!%p20_p4) target bundleno = 7 (0x7), region = 104 }
 0x18a   :  { %537 = vsyncpa [#allocation3], 1 }
 0x18b   :  { %539 = vsyncpa [#allocation3 + $0x1], 1 }
 0x18c   :  { %540 = vsyncpa [#allocation6], 1 }
 0x18d   :  { %542 = vsyncpa [#allocation6 + $0x1], 1 }
 0x18e   :  { %543 = vsyncpa [#allocation4], 1 }
 0x18f   :  { %545 = vsyncpa [#allocation4 + $0x1], 1 }

</bundles_post_ra>
